<compile_context>
chip_gen: v7x
topology: tpu7x:2x2x1
jax: 0.10.0
libtpu: 0.0.40
codegen_flags: <defaults>
</compile_context>

<pallas_src>
import numpy as np
import jax
import jax.numpy as jnp
from jax.experimental import pallas as pl
from jax.experimental.pallas import tpu as pltpu


def _gaussian_1d(scale):
    """PyTorch-matching kernel construction, factored to 1D.

    sigma = 0.5*sqrt(scale^2-1); size = int(1+2*2.5*sigma), made odd;
    k3(x,y,z) = exp(-(x^2+y^2+z^2)/(2 sigma^2)) normalized  ==  w1 (x) w1 (x) w1
    with w1 the normalized 1D Gaussian (exact factorization).
    """
    sigma = 0.5 * (scale ** 2 - 1) ** 0.5
    size = int(1 + 2 * 2.5 * sigma)
    if size % 2 == 0:
        size += 1
    r = np.arange(size, dtype=np.float64) - size // 2
    g = np.exp(-r ** 2 / (2.0 * sigma ** 2))
    return g / g.sum(), size


def _conv_matrix(n_in, w1, stride):
    """Banded (n_out, n_in) matrix for a 1D cross-correlation with
    padding=size//2, zero boundary, given stride:
        out[o] = sum_k w1[k] * in[o*stride + k - pad]."""
    size = len(w1)
    pad = size // 2
    n_out = (n_in + 2 * pad - size) // stride + 1
    m = np.zeros((n_out, n_in), dtype=np.float64)
    for o in range(n_out):
        for k in range(size):
            i = o * stride + k - pad
            if 0 <= i < n_in:
                m[o, i] += w1[k]
    return m, n_out


def _pick_tb(bp, x, xo, vol_in_bytes, vol_out_bytes, vmem_budget=4 << 20):
    """Largest batch-tile TB that (a) divides Bp, (b) keeps blocks (8,128)-legal,
    (c) fits a modest VMEM budget (double-buffered in+out), and (d) leaves >=2
    grid steps so the batch axis can still shard across TensorCores (v7x)."""
    best = bp  # full-array blocks are always legal (single grid step fallback)
    for d in range(1, bp):
        if bp % d:
            continue
        if (d * x) % 8 or (d * xo) % 8:
            continue
        if 2 * d * (vol_in_bytes + vol_out_bytes) > vmem_budget:
            continue
        if bp // d < 2:
            continue
        best = d
    return best


def _lowpass_kernel(x_ref, myz_ref, bmx_ref, o_ref):
    # x_ref:   (TB*X,  Y*Z)    -- lane-dense input block
    # myz_ref: (Y*Z,   Yo*Zo)  -- kron(My, Mz)^T: y/z conv (+pad+stride)
    # bmx_ref: (TB*Xo, TB*X)   -- kron(I_TB, Mx): x-axis conv (+pad+stride)
    # o_ref:   (TB*Xo, Yo*Zo)
    x = x_ref[...].astype(jnp.float32)  # cast once at entry (bf16-safe)
    # Y/Z conv first: shrinks lane width before the batched x conv (stride>1).
    t = jnp.dot(x, myz_ref[...], preferred_element_type=jnp.float32)
    o = jnp.dot(bmx_ref[...], t, preferred_element_type=jnp.float32)
    o_ref[...] = o.astype(o_ref.dtype)


def low_pass_filter(image, scale, stride=1):
    """JAX/Pallas port of low_pass_filter(image, scale, stride).

    image: [..., x, y, z]
    """
    if scale <= 1:
        assert stride == 1
        return image

    w1, _size = _gaussian_1d(scale)

    lead = image.shape[:-3]
    X, Y, Z = image.shape[-3:]
    Bp = int(np.prod(lead)) if lead else 1

    Mx, Xo = _conv_matrix(X, w1, stride)
    My, Yo = _conv_matrix(Y, w1, stride)
    Mz, Zo = _conv_matrix(Z, w1, stride)

    itemsize = np.dtype(image.dtype).itemsize
    TB = _pick_tb(Bp, X, Xo, X * Y * Z * itemsize, Xo * Yo * Zo * itemsize)

    myz_t = jnp.asarray(np.kron(My, Mz).T, dtype=jnp.float32)       # (Y*Z, Yo*Zo)
    bmx = jnp.asarray(np.kron(np.eye(TB), Mx), dtype=jnp.float32)   # (TB*Xo, TB*X)

    # Free (contiguous) reshape: (lead..., X, Y, Z) -> (Bp*X, Y*Z)
    x2d = image.reshape((Bp * X, Y * Z))
    grid = (Bp // TB,)

    out2d = pl.pallas_call(
        _lowpass_kernel,
        out_shape=jax.ShapeDtypeStruct((Bp * Xo, Yo * Zo), image.dtype),
        grid_spec=pltpu.PrefetchScalarGridSpec(
            num_scalar_prefetch=0,
            grid=grid,
            in_specs=[
                pl.BlockSpec((TB * X, Y * Z), lambda i: (i, 0)),
                pl.BlockSpec((Y * Z, Yo * Zo), lambda i: (0, 0)),
                pl.BlockSpec((TB * Xo, TB * X), lambda i: (0, 0)),
            ],
            out_specs=pl.BlockSpec((TB * Xo, Yo * Zo), lambda i: (i, 0)),
        ),
        compiler_params=pltpu.CompilerParams(
            dimension_semantics=("parallel",)),
    )(x2d, myz_t, bmx)

    # Free reshape back: (Bp*Xo, Yo*Zo) -> (lead..., Xo, Yo, Zo)
    return out2d.reshape(lead + (Xo, Yo, Zo))


class LowPass:
    """Mirror of the PyTorch nn.Module (stateless)."""

    def __init__(self, scale, stride):
        self.scale = scale
        self.stride = stride

    def __call__(self, inp):
        return low_pass_filter(inp, self.scale, self.stride)


def _reference(image, scale, stride):
    """Pure-JAX reference matching F.conv3d with the PyTorch 3D Gaussian tap."""
    if scale <= 1:
        return image
    sigma = 0.5 * (scale ** 2 - 1) ** 0.5
    size = int(1 + 2 * 2.5 * sigma)
    if size % 2 == 0:
        size += 1
    pad = size // 2
    r = np.arange(size, dtype=np.float64) - size // 2
    k3 = np.exp(-(r[:, None, None] ** 2 + r[None, :, None] ** 2
                  + r[None, None, :] ** 2) / (2.0 * sigma ** 2))
    k3 = (k3 / k3.sum()).astype(np.float32)

    lead = image.shape[:-3]
    X, Y, Z = image.shape[-3:]
    x = image.reshape((-1, 1, X, Y, Z))
    w = jnp.asarray(k3).reshape((1, 1, size, size, size))
    out = jax.lax.conv_general_dilated(
        x, w,
        window_strides=(stride, stride, stride),
        padding=[(pad, pad)] * 3,
        dimension_numbers=("NCDHW", "OIDHW", "NCDHW"),
        precision=jax.lax.Precision.HIGHEST,
    )
    return out.reshape(lead + out.shape[-3:])


if __name__ == "__main__":
    key = jax.random.PRNGKey(0)
    # batch=2, channels=4, 16^3 voxel grid (NCXYZ, like conv3d NCDHW)
    x = jax.random.normal(key, (2, 4, 16, 16, 16), dtype=jnp.float32)

    scale, stride = 2, 2
    mod = LowPass(scale, stride)

    out = jax.block_until_ready(mod(x))
    ref = jax.block_until_ready(_reference(x, scale, stride))

    assert out.shape == ref.shape, (out.shape, ref.shape)
    err = float(jnp.max(jnp.abs(out - ref)))
    # MXU f32 matmuls at default precision may use bf16 passes -> allow ~1e-3 abs.
    assert err < 5e-3, err
    print("KERNEL_OK")
</pallas_src>

<mosaic_0001>
module attributes {stable_mosaic.version = 11 : i64} {
  func.func @_lowpass_kernel(%arg0: i32, %arg1: memref<64x256xf32, #tpu.memory_space<vmem>>, %arg2: memref<256x64xf32, #tpu.memory_space<vmem>>, %arg3: memref<32x64xf32, #tpu.memory_space<vmem>>, %arg4: memref<32x64xf32, #tpu.memory_space<vmem>>) attributes {dimension_semantics = [#tpu.dimension_semantics<parallel>], iteration_bounds = array<i64: 2>, scalar_prefetch = 0 : i64, scratch_operands = 0 : i64, tpu.core_type = #tpu.core_type<tc>, window_params = [{transform_indices = @transform_0, window_bounds = array<i64: 64, 256>}, {pipeline_mode = #tpu.pipeline_mode<synchronous>, transform_indices = @transform_1, window_bounds = array<i64: 256, 64>}, {pipeline_mode = #tpu.pipeline_mode<synchronous>, transform_indices = @transform_2, window_bounds = array<i64: 32, 64>}, {transform_indices = @transform_3, window_bounds = array<i64: 32, 64>}]} {
    %c0 = arith.constant 0 : index
    %c0_0 = arith.constant 0 : index
    %0 = vector.load %arg1[%c0, %c0_0] : memref<64x256xf32, #tpu.memory_space<vmem>>, vector<64x256xf32>
    %c0_1 = arith.constant 0 : index
    %c0_2 = arith.constant 0 : index
    %1 = vector.load %arg2[%c0_1, %c0_2] : memref<256x64xf32, #tpu.memory_space<vmem>>, vector<256x64xf32>
    %cst = arith.constant dense<0.000000e+00> : vector<64x64xf32>
    %2 = tpu.matmul %0, %1, %cst {dimension_numbers = #tpu.dot_dimension_numbers<[1], [0], [0], [1], [0, 0, 1, 1], [], []>} : vector<64x256xf32>, vector<256x64xf32>, vector<64x64xf32> -> vector<64x64xf32>
    %c0_3 = arith.constant 0 : index
    %c0_4 = arith.constant 0 : index
    %3 = vector.load %arg3[%c0_3, %c0_4] : memref<32x64xf32, #tpu.memory_space<vmem>>, vector<32x64xf32>
    %cst_5 = arith.constant dense<0.000000e+00> : vector<32x64xf32>
    %4 = tpu.matmul %3, %2, %cst_5 {dimension_numbers = #tpu.dot_dimension_numbers<[1], [0], [0], [1], [0, 0, 1, 1], [], []>} : vector<32x64xf32>, vector<64x64xf32>, vector<32x64xf32> -> vector<32x64xf32>
    %c0_6 = arith.constant 0 : index
    %c0_7 = arith.constant 0 : index
    %5 = vector.load %arg4[%c0_6, %c0_7] : memref<32x64xf32, #tpu.memory_space<vmem>>, vector<32x64xf32>
    tpu.vector_store %arg4[%c0_6, %c0_7], %4 {strides = array<i32>} : memref<32x64xf32, #tpu.memory_space<vmem>>, vector<32x64xf32>,
    return
  }
  func.func @transform_0(%arg0: i32) -> (i32, i32) {
    %c0_i32 = arith.constant 0 : i32
    %c0_i32_0 = arith.constant 0 : i32
    return %arg0, %c0_i32 : i32, i32
  }
  func.func @transform_1(%arg0: i32) -> (i32, i32) {
    %c0_i32 = arith.constant 0 : i32
    %c0_i32_0 = arith.constant 0 : i32
    %c0_i32_1 = arith.constant 0 : i32
    return %c0_i32, %c0_i32_0 : i32, i32
  }
  func.func @transform_2(%arg0: i32) -> (i32, i32) {
    %c0_i32 = arith.constant 0 : i32
    %c0_i32_0 = arith.constant 0 : i32
    %c0_i32_1 = arith.constant 0 : i32
    return %c0_i32, %c0_i32_0 : i32, i32
  }
  func.func @transform_3(%arg0: i32) -> (i32, i32) {
    %c0_i32 = arith.constant 0 : i32
    %c0_i32_0 = arith.constant 0 : i32
    return %arg0, %c0_i32 : i32, i32
  }
}

</mosaic_0001>

<bundles_post_ra>
// kernel: tpu_custom_call.1
= control target key start
LH: loop header
LB: loop body
LE: loop exit
PB: predicated region body
PF: predicated region fallthrough
CT: control target
= control target key end

     0   :  { %8 = vsyncpa [#allocation3], 0  ;;  %s1031_s0 = inlined_call_operand.vmem [shape: f32[128,256], index: 0, kind: input, shape index: {}]   ;;  %s1032_s1 = inlined_call_operand.vmem [shape: f32[256,64], index: 1, kind: input, shape index: {}]   ;;  %s1033_s2 = inlined_call_operand.vmem [shape: f32[32,64], index: 2, kind: input, shape index: {}]   ;;  %s1034_s3 = inlined_call_operand.hbm [shape: f32[64,64], index: 3, kind: output, shape index: {}]  }
   0x1   :  { %10 = vsyncpa [#allocation3 + $0x1], 0  ;;  %s795_s12 = smov 0   ;;  %s797_s13 = smov 0  }
   0x2   :  { %s799_s14 = smov 0   ;;  %s801_s15 = smov 0  }
   0x3 LB: > { %s816_s16 = sadd.s32 4294967295, %s770_s15   ;;  %s510_s17 = sadd.s32 4294967294, %s770_s15   ;;  %s770_s15 = sphi %s801_s15, %s1040_s15   ;;  %s766_s14 = sphi %s799_s14, %s1039_s14   ;;  %s762_s13 = sphi %s797_s13, %s1038_s13   ;;  %s758_s12 = sphi %s795_s12, %s1037_s12  }
   0x4   : > { %s820_s18 = sadd.s32 1, %s770_s15   ;;  %s91_s19 = sadd.s32 1, %s766_s14 }
   0x5   : > { %s88_s20 = ssub.s32 %s770_s15, %s820_s18  ;;  %p101_p0 = scmp.ne.s32.totalorder %s766_s14, %s762_s13 }
   0x6   : > { %p89_p1 = scmp.eq.s32.totalorder %s88_s20, 0  ;;  %p102_p2 = scmp.eq.s32.totalorder %s816_s16, 1 }
   0x7   : > { %p107_p3 = scmp.ne.s32.totalorder %s762_s13, %s758_s12  ;;  %p108_p4 = scmp.eq.s32.totalorder %s510_s17, 1 }
   0x8   : > { %s831_s21 = scalar_select %p89_p1, %s766_s14, %s91_s19  }
   0x9   : > { %p833_p5 = por %p102_p2, %p101_p0  ;;  %p837_p6 = por %p108_p4, %p107_p3 }
   0xa   : > { %p513_p7 = scmp.ge.s32.totalorder %s770_s15, 1  ;;  %p142_p8 = scmp.lt.s32.totalorder %s770_s15, 3 }
   0xc   : > { %p143_p9 = pnand %p513_p7, %p142_p8 }
   0xd   : > { %v207_v0 = vld [vmem:[%s1032_s1 + $0x80] sm:$0xff] (!%p143_p9)  ;;  %v208_v1 = vld [vmem:[%s1032_s1 + $0x88] sm:$0xff] (!%p143_p9)  ;;  %s515_s30 = sshll.u32 (!%p143_p9), %s816_s16, 3  ;;  %v209_v5 = vld [vmem:[%s1032_s1 + $0x90] sm:$0xff] (!%p143_p9)  ;;  %vm332_vm0 = vcmask (!%p143_p9), 523264   ;;  %s164_s4 = sand.u32 (!%p143_p9), 1, %s762_s13  }
   0xe   : > { %146 = sbr.rel (%p143_p9) target bundleno = 529 (0x211), region = 32  ;;  %v191_v2 = vld [vmem:[%s1032_s1] sm:$0xff] (!%p143_p9)  ;;  %v619_v3 = vpack.c.bf16 (!%p143_p9), %v208_v1, %v207_v0  ;;  %v192_v4 = vld [vmem:[%s1032_s1 + $0x8] sm:$0xff] (!%p143_p9)  ;;  %v210_v6 = vld [vmem:[%s1032_s1 + $0x98] sm:$0xff] (!%p143_p9)  ;;  %p168_p10 = scmp.lt.s32.totalorder (!%p143_p9), %s515_s30, 15 }
   0xf   : > { %v621_v7 = vpack.c.bf16 (!%p143_p9), %v192_v4, %v191_v2  ;;  %v623_v8 = vpack.c.bf16 (!%p143_p9), %v210_v6, %v209_v5  ;;  %v193_v9 = vld [vmem:[%s1032_s1 + $0x10] sm:$0xff] (!%p143_p9)  ;;  %v194_v10 = vld [vmem:[%s1032_s1 + $0x18] sm:$0xff] (!%p143_p9)  ;;  %v211_v11 = vld [vmem:[%s1032_s1 + $0xa0] sm:$0xff] (!%p143_p9)  ;;  %s528_s8 = sshll.u32 (!%p143_p9), %s816_s16, 9  ;;  %s990_s16 = scalar_lea.sflag (!%p143_p9), [#allocation3], %s164_s4 }
  0x10   : > { %620 = vmatprep.subr.bf16.mxu0 (!%p143_p9), %v619_v3  ;;  %v212_v12 = vld [vmem:[%s1032_s1 + $0xa8] sm:$0xff] (!%p143_p9)  ;;  %v625_v13 = vpack.c.bf16 (!%p143_p9), %v194_v10, %v193_v9  ;;  %v195_v15 = vld [vmem:[%s1032_s1 + $0x20] sm:$0xff] (!%p143_p9)  ;;  %v213_v17 = vld [vmem:[%s1032_s1 + $0xb0] sm:$0xff] (!%p143_p9)  ;;  %s986_s11 = scalar_lea.hbm (!%p143_p9), %s1034_s3, %s528_s8 }
  0x11   : > { %622 = vmatpush3.bf16.msra.mxu0 (!%p143_p9), %v621_v7  ;;  %v627_v14 = vpack.c.bf16 (!%p143_p9), %v212_v12, %v211_v11  ;;  %v196_v16 = vld [vmem:[%s1032_s1 + $0x28] sm:$0xff] (!%p143_p9)  ;;  %v214_v18 = vld [vmem:[%s1032_s1 + $0xb8] sm:$0xff] (!%p143_p9)  ;;  %v197_v21 = vld [vmem:[%s1032_s1 + $0x30] sm:$0xff] (!%p143_p9) }
  0x12   : > { %624 = vmatprep.subr.bf16.mxu0 (!%p143_p9), %v623_v8  ;;  %v629_v19 = vpack.c.bf16 (!%p143_p9), %v196_v16, %v195_v15  ;;  %v631_v20 = vpack.c.bf16 (!%p143_p9), %v214_v18, %v213_v17  ;;  %v198_v22 = vld [vmem:[%s1032_s1 + $0x38] sm:$0xff] (!%p143_p9)  ;;  %v215_v23 = vld [vmem:[%s1032_s1 + $0xc0] sm:$0xff] (!%p143_p9)  ;;  %v216_v24 = vld [vmem:[%s1032_s1 + $0xc8] sm:$0xff] (!%p143_p9) }
  0x13   : > { %v633_v26 = vpack.c.bf16 (!%p143_p9), %v198_v22, %v197_v21  ;;  %v635_v27 = vpack.c.bf16 (!%p143_p9), %v216_v24, %v215_v23  ;;  %v199_v28 = vld [vmem:[%s1032_s1 + $0x40] sm:$0xff] (!%p143_p9)  ;;  %v200_v29 = vld [vmem:[%s1032_s1 + $0x48] sm:$0xff] (!%p143_p9)  ;;  %v217_v30 = vld [vmem:[%s1032_s1 + $0xd0] sm:$0xff] (!%p143_p9) }
  0x14   : > { %v218_v31 = vld [vmem:[%s1032_s1 + $0xd8] sm:$0xff] (!%p143_p9)  ;;  %v637_v32 = vpack.c.bf16 (!%p143_p9), %v200_v29, %v199_v28  ;;  %v201_v34 = vld [vmem:[%s1032_s1 + $0x50] sm:$0xff] (!%p143_p9)  ;;  %v219_v36 = vld [vmem:[%s1032_s1 + $0xe0] sm:$0xff] (!%p143_p9) }
  0x15   : > { %s1042_s30 = smov (!%p168_p10, %s515_s30), 15  ;;  %626 = vmatpush3.bf16.msra.mxu0 %v625_v13  ;;  %v639_v33 = vpack.c.bf16 %v218_v31, %v217_v30  ;;  %v202_v35 = vld [vmem:[%s1032_s1 + $0x58] sm:$0xff]  ;;  %v220_v37 = vld [vmem:[%s1032_s1 + $0xe8] sm:$0xff]  ;;  %v203_v40 = vld [vmem:[%s1032_s1 + $0x60] sm:$0xff] }
  0x16   : > { %s527_s5 = sshll.u32 %s1042_s30, 4  ;;  %628 = vmatprep.subr.bf16.mxu0 %v627_v14  ;;  %v641_v38 = vpack.c.bf16 %v202_v35, %v201_v34  ;;  %v643_v39 = vpack.c.bf16 %v220_v37, %v219_v36  ;;  %v204_v41 = vld [vmem:[%s1032_s1 + $0x68] sm:$0xff]  ;;  %v221_v42 = vld [vmem:[%s1032_s1 + $0xf0] sm:$0xff]  ;;  %v222_v43 = vld [vmem:[%s1032_s1 + $0xf8] sm:$0xff]  ;;  %s772_s30 = smov [#allocation2]  }
  0x17   : > { %s889_s17 = scalar_lea.vmem %s1031_s0, %s527_s5  ;;  %v645_v44 = vpack.c.bf16 %v204_v41, %v203_v40  ;;  %v647_v45 = vpack.c.bf16 %v222_v43, %v221_v42  ;;  %v205_v46 = vld [vmem:[%s1032_s1 + $0x70] sm:$0xff]  ;;  %v206_v47 = vld [vmem:[%s1032_s1 + $0x78] sm:$0xff]  ;;  %v328_v0 = vld [vmem:[%s1033_s2] sm:$0xff]  ;;  %s514_s5 = sshll.u32 %s164_s4, 5 }
  0x18   : > { %v176_v25 = vld [vmem:[%s889_s17 + $0x8] sm:$0xff]  ;;  %v649_v48 = vpack.c.bf16 %v206_v47, %v205_v46  ;;  %v175_v49 = vld [vmem:[%s889_s17] sm:$0xff]  ;;  %v178_v50 = vld [vmem:[%s889_s17 + $0x18] sm:$0xff]  ;;  %613 = vmatprep.mubr.msk.f32.mxu1 %vm332_vm0, %v328_v0  ;;  %s166_s6 = scalar_lea.vmem [#allocation2], %s514_s5  ;;  %s712_s20 = sshll.u32 %s772_s30, 4  ;;  %s713_s20 = int_to_ptr.vmem [resolvable:$false] %s712_s20 }
  0x19   : > { %287 = vmatprep.mubr.f32.mxu0 %v176_v25  ;;  %630 = vmatpush3.bf16.msra.mxu0 %v629_v19  ;;  %v177_v51 = vld [vmem:[%s889_s17 + $0x10] sm:$0xff]  ;;  %v180_v52 = vld [vmem:[%s889_s17 + $0x28] sm:$0xff]  ;;  %v179_v53 = vld [vmem:[%s889_s17 + $0x20] sm:$0xff]  ;;  %s448_s7 = sshll.u32 %s166_s6, 4  ;;  %s714_s24 = scalar_lea.vmem %s713_s20, 1024  ;;  %s981_s7 = int_to_ptr.vmem [resolvable:$true] %s448_s7 }
  0x1a   : > { %632 = vmatprep.subr.bf16.mxu0 %v631_v20  ;;  %v182_v54 = vld [vmem:[%s889_s17 + $0x38] sm:$0xff]  ;;  %v181_v55 = vld [vmem:[%s889_s17 + $0x30] sm:$0xff]  ;;  %v184_v56 = vld [vmem:[%s889_s17 + $0x48] sm:$0xff]  ;;  %s708_s19 = scalar_lea.vmem %s981_s7, 512  ;;  %p715_p0 = scmp.lt.s32.totalorder %s981_s7, %s713_s20 }
  0x1b   : > { %v183_v57 = vld [vmem:[%s889_s17 + $0x40] sm:$0xff]  ;;  %v186_v58 = vld [vmem:[%s889_s17 + $0x58] sm:$0xff]  ;;  %v185_v59 = vld [vmem:[%s889_s17 + $0x50] sm:$0xff]  ;;  %p709_p11 = scmp.ne.s32.totalorder %s981_s7, %s708_s19  ;;  %p716_p1 = scmp.lt.s32.totalorder %s714_s24, %s708_s19 }
  0x1c   : > { %v188_v60 = vld [vmem:[%s889_s17 + $0x68] sm:$0xff]  ;;  %v187_v61 = vld [vmem:[%s889_s17 + $0x60] sm:$0xff]  ;;  %v190_v62 = vld [vmem:[%s889_s17 + $0x78] sm:$0xff] }
  0x1d   : > { %634 = vmatpush3.bf16.msra.mxu0 %v633_v26  ;;  %v189_v63 = vld [vmem:[%s889_s17 + $0x70] sm:$0xff]  ;;  %v329_v29 = vld [vmem:[%s1033_s2 + $0x8] sm:$0xff]  ;;  %v331_v31 = vld [vmem:[%s1033_s2 + $0x18] sm:$0xff]  ;;  %p710_p12 = pnand %p709_p11, %p833_p5  ;;  %p717_p2 = por %p716_p1, %p715_p0 }
  0x1e   : > { %636 = vmatprep.subr.bf16.mxu0 %v635_v27  ;;  %v330_v30 = vld [vmem:[%s1033_s2 + $0x10] sm:$0xff] }
  0x1f   : > { %p711_p13 = pneg %p710_p12 }
  0x21   : > { %638 = vmatpush3.bf16.msra.mxu0 %v637_v32  ;;  %p718_p3 = pnand %p717_p2, %p711_p13 }
  0x22   : > { %640 = vmatprep.subr.bf16.mxu0 %v639_v33 }
  0x25   : > { %642 = vmatpush3.bf16.msra.mxu0 %v641_v38 }
  0x26   : > { %644 = vmatprep.subr.bf16.mxu0 %v643_v39 }
  0x29   : > { %646 = vmatpush3.bf16.msra.mxu0 %v645_v44 }
  0x2a   : > { %648 = vmatprep.subr.bf16.mxu0 %v647_v45 }
  0x2d   : > { %650 = vmatpush3.bf16.msra.mxu0 %v649_v48 }
  0x30   : > { %288 = vmatmul.mubr.f32.vlgmr.msra.gmra.mrb[0].mxu0 %v175_v49 }
  0x31   : > { %292 = vmatprep.mubr.f32.mxu0 %v178_v50 }
  0x34   : > { %293 = vmatmul.mubr.f32.gmra.mrb[2].mxu0 %v177_v51 }
  0x35   : > { %297 = vmatprep.mubr.f32.mxu0 %v180_v52 }
  0x38   : > { %298 = vmatmul.mubr.f32.gmra.mrb[4].mxu0 %v179_v53 }
  0x39   : > { %302 = vmatprep.mubr.f32.mxu0 %v182_v54 }
  0x3c   : > { %303 = vmatmul.mubr.f32.gmra.mrb[6].mxu0 %v181_v55 }
  0x3d   : > { %307 = vmatprep.mubr.f32.mxu0 %v184_v56 }
  0x40   : > { %308 = vmatmul.mubr.f32.gmra.mrb[8].mxu0 %v183_v57 }
  0x41   : > { %312 = vmatprep.mubr.f32.mxu0 %v186_v58 }
  0x44   : > { %313 = vmatmul.mubr.f32.gmra.mrb[10].mxu0 %v185_v59 }
  0x45   : > { %317 = vmatprep.mubr.f32.mxu0 %v188_v60 }
  0x48   : > { %318 = vmatmul.mubr.f32.gmra.mrb[12].mxu0 %v187_v61 }
  0x49   : > { %322 = vmatprep.mubr.f32.mxu0 %v190_v62 }
  0x4c   : > { %323 = vmatmul.mubr.f32.gmra.mrb[14].mxu0 %v189_v63 }
 0x103   : > { %v561_v1 = vpop.f32.mrb[0].mxu0 }
 0x104   : > { %v562_v2 = vpop.f32.mrb[1].mxu0 }
 0x105   : > { %v563_v3 = vadd.f32 %v562_v2, %v561_v1 }
 0x107   : > { %v564_v4 = vpop.f32.mrb[2].mxu0 }
 0x108   : > { %v565_v5 = vpop.f32.mrb[3].mxu0 }
 0x109   : > { %v566_v6 = vadd.f32 %v565_v5, %v564_v4 }
 0x10b   : > { %v567_v7 = vpop.f32.mrb[4].mxu0  ;;  %v651_v8 = vpack.c.bf16 %v566_v6, %v563_v3 }
 0x10c   : > { %v568_v9 = vpop.f32.mrb[5].mxu0 }
 0x10d   : > { %v569_v10 = vadd.f32 %v568_v9, %v567_v7  ;;  %652 = vmatprep.subr.bf16.mxu1 %v651_v8 }
 0x10e   : > { %654 = vmatpush3.bf16.msra.mxu1 %v651_v8 }
 0x10f   : > { %v570_v11 = vpop.f32.mrb[6].mxu0 }
 0x110   : > { %v571_v12 = vpop.f32.mrb[7].mxu0 }
 0x111   : > { %v572_v13 = vadd.f32 %v571_v12, %v570_v11 }
 0x113   : > { %v655_v14 = vpack.c.bf16 %v572_v13, %v569_v10  ;;  %v573_v15 = vpop.f32.mrb[8].mxu0 }
 0x114   : > { %v574_v16 = vpop.f32.mrb[9].mxu0 }
 0x115   : > { %v575_v17 = vadd.f32 %v574_v16, %v573_v15  ;;  %656 = vmatprep.subr.bf16.mxu1 %v655_v14 }
 0x116   : > { %658 = vmatpush3.bf16.msra.mxu1 %v655_v14 }
 0x117   : > { %v576_v18 = vpop.f32.mrb[10].mxu0 }
 0x118   : > { %v577_v19 = vpop.f32.mrb[11].mxu0 }
 0x119   : > { %v578_v20 = vadd.f32 %v577_v19, %v576_v18 }
 0x11b   : > { %v659_v21 = vpack.c.bf16 %v578_v20, %v575_v17  ;;  %v579_v22 = vpop.f32.mrb[12].mxu0 }
 0x11c   : > { %v580_v23 = vpop.f32.mrb[13].mxu0 }
 0x11d   : > { %v581_v24 = vadd.f32 %v580_v23, %v579_v22  ;;  %660 = vmatprep.subr.bf16.mxu1 %v659_v21 }
 0x11e   : > { %662 = vmatpush3.bf16.msra.mxu1 %v659_v21 }
 0x11f   : > { %v582_v25 = vpop.f32.mrb[14].mxu0 }
 0x120   : > { %v583_v26 = vpop.f32.mrb[15].mxu0 }
 0x121   : > { %v584_v27 = vadd.f32 %v583_v26, %v582_v25 }
 0x123   : > { %v663_v28 = vpack.c.bf16 %v584_v27, %v581_v24 }
 0x125   : > { %664 = vmatprep.subr.bf16.mxu1 %v663_v28 }
 0x126   : > { %666 = vmatpush3.bf16.msra.mxu1 %v663_v28 }
 0x129   : > { %614 = vmatmul.mubr.msk.f32.vlgmr.msra.gmra.mrb[0].mxu1 %vm332_vm0, %v329_v29 }
 0x12a   : > { %616 = vmatprep.mubr.msk.f32.mxu1 %vm332_vm0, %v330_v30 }
 0x12d   : > { %617 = vmatmul.mubr.msk.f32.gmra.mrb[2].mxu1 %vm332_vm0, %v331_v31 }
 0x1fc   : > { %v615_v32 = vpop.f32.mrb[0].mxu1 }
 0x1fd   : > { %431 = vst.msk [vmem:[%s166_s6 + $0x8] sm:$0xff] %vm332_vm0, %v615_v32  ;;  %v411_v33 = vpop.f32.mrb[1].mxu1 }
 0x1fe   : > { %430 = vst.msk [vmem:[%s166_s6] sm:$0xff] %vm332_vm0, %v411_v33 }
 0x200   : > { %v618_v34 = vpop.f32.mrb[2].mxu1 }
 0x201   : > { %433 = vst.msk [vmem:[%s166_s6 + $0x18] sm:$0xff] %vm332_vm0, %v618_v34  ;;  %v421_v35 = vpop.f32.mrb[3].mxu1 }
 0x202   : > { %432 = vst.msk [vmem:[%s166_s6 + $0x10] sm:$0xff] %vm332_vm0, %v421_v35 }
 0x203   : > { %721 = shalt.err (!%p718_p3)
}
 0x204   : > { %s722_s17 = scalar_lea.hbm %s986_s11, 512  ;;  %s726_s27 = scalar_lea.hbm %s1034_s3, 1024 }
 0x205   : > { %p723_p4 = scmp.ne.s32.totalorder %s986_s11, %s722_s17  ;;  %p727_p9 = scmp.lt.u32.totalorder %s986_s11, %s1034_s3 }
 0x206   : > { %p728_p10 = scmp.lt.u32.totalorder %s726_s27, %s722_s17  ;;  %p730_p12 = scmp.lt.u32.totalorder %s722_s17, %s986_s11 }
 0x207   : > { %p724_p7 = pnand %p723_p4, %p833_p5 }
 0x208   : > { %p729_p11 = por %p728_p10, %p727_p9 }
 0x209   : > { %p725_p8 = pneg %p724_p7 }
 0x20a   : > { %p731_p13 = por %p730_p12, %p729_p11 }
 0x20c   : > { %p732_p0 = pnand %p731_p13, %p725_p8 }
 0x20e   : > { %735 = shalt.err (!%p732_p0)
}
 0x20f   : > { %s773_s4 = smov 128   ;;  %s774_s5 = smov 8  }
 0x210   : > { %667 = dma.vmem_to_hbm [thread:$0]  (%p833_p5), %s981_s7, 512, %s986_s11, %s990_s16, %s773_s4, %s773_s4, %s774_s5  }
 0x211 PF: > { %p673_p1 = scmp.ge.s32.totalorder %s770_s15, 2  ;;  %s463_s6 = sand.u32 1, %s758_s12  }
 0x212   : > { %s464_s8 = scalar_lea.sflag [#allocation3], %s463_s6 }
 0x213   : > { %p670_p2 = pnand %p673_p1, %p837_p6 }
 0x215   : > { %753 = dma.done.wait (!%p670_p2), %s464_s8, 512  }
 0x216   : > { %755 = vsyncadd (!%p670_p2), %s464_s8, 4294966784  ;;  %p13_p3 = scmp.ge.s32.totalorder %s820_s18, 4   ;;  %s1037_s12 = smov %s762_s13 }
 0x217   : > { %s1038_s13 = smov %s766_s14  ;;  %s1039_s14 = smov %s831_s21 }
 0x218   : > { %s1040_s15 = smov %s820_s18  ;;  %15 = sbr.rel (!%p13_p3) target bundleno = 3 (0x3), region = 67 }
 0x21f   :  { %469 = vsyncpa [#allocation3], 1 }
 0x220   :  { %471 = vsyncpa [#allocation3 + $0x1], 1 }

</bundles_post_ra>
